<compile_context>
chip_gen: v5e
topology: v5e:2x2
jax: 0.10.0
libtpu: 0.0.40
codegen_flags: <defaults>
</compile_context>

<pallas_src>
import jax
import jax.numpy as jnp
from jax.experimental import pallas as pl
from jax.experimental.pallas import tpu as pltpu


def _make_kernel(T, B, D, H, F1):
    G = 4 * H  # lane width of every packed slab (== 128 at these shapes)

    def kernel(x_ref, w_ref, b_ref, out_ref):
        # ---- static sublane slices of the packed slabs (offsets are multiples of 8) -------
        wx = w_ref[0:D, :]                            # (D,  4H) input projection
        wh = w_ref[D:D + H, :]                        # (H,  4H) recurrent
        w1 = w_ref[D + H:D + 2 * H, :]                # (H,  F1) fc_1
        w2 = w_ref[D + 2 * H:D + 2 * H + F1, :]       # (F1, 4H) fc (lane-padded classifier)
        b_all = b_ref[...]                            # (3,  4H) read once
        b_lstm = b_all[0:1, :]
        b1 = b_all[1:2, :]
        b2 = b_all[2:3, :]

        # ---- hoisted input projection: all timesteps in one MXU matmul + one bias add -----
        xw = jnp.dot(x_ref[...], wx,
                     preferred_element_type=jnp.float32) + b_lstm   # (T*B, 4H)

        # Constant lane mask selecting the g-gate columns (hoisted out of the loop).
        lane = jax.lax.broadcasted_iota(jnp.int32, (B, G), 1)
        g_mask = (lane >= 2 * H) & (lane < 3 * H)

        h = jnp.zeros((B, H), jnp.float32)
        c = jnp.zeros((B, H), jnp.float32)

        # ---- recurrence: only h @ Wh + one EUP pass + cell update on the serial path ------
        for t in range(T):                            # static full unroll (T is small)
            gates = xw[t * B:(t + 1) * B, :] + jnp.dot(
                h, wh, preferred_element_type=jnp.float32)          # (B, 4H)

            # Single full-vreg sigmoid; g gate (pre-activation pre-scaled by 2 at pack time)
            # recovered as tanh(x) = 2*sigmoid(2x) - 1 with one masked select/FMA.
            s = jax.nn.sigmoid(gates)
            acts = jnp.where(g_mask, 2.0 * s - 1.0, s)

            i_g = acts[:, 0 * H:1 * H]
            f_g = acts[:, 1 * H:2 * H]
            g_g = acts[:, 2 * H:3 * H]
            o_g = acts[:, 3 * H:4 * H]

            c = f_g * c + i_g * g_g
            h = o_g * jnp.tanh(c)

        # ---- head: relu -> fc_1 -> relu -> fc (classifier lane-padded to 4H columns) ------
        hid = jnp.maximum(h, 0.0)
        z1 = jnp.maximum(
            jnp.dot(hid, w1, preferred_element_type=jnp.float32) + b1, 0.0)
        z2 = jnp.dot(z1, w2, preferred_element_type=jnp.float32) + b2
        out_ref[...] = z2.astype(out_ref.dtype)       # (B, 4H), cols >= C are exactly zero

    return kernel


def pack_params(params):
    """Pack the tiny per-layer weights into two DMA-friendly slabs + apply the g-gate x2."""
    wx, wh, b = params["wx"], params["wh"], params["b"]
    w1, b1 = params["w1"], params["b1"]
    w2, b2 = params["w2"], params["b2"]

    D, G = wx.shape
    H = wh.shape[0]
    F1 = w1.shape[1]
    C = w2.shape[1]
    assert G == 4 * H and F1 == G and C <= G, "packing assumes 4H == F1 == 128 >= num_classes"
    assert D % 8 == 0 and H % 8 == 0 and F1 % 8 == 0, "sublane-aligned slab offsets required"

    # tanh(x) == 2*sigmoid(2x) - 1: pre-scale the g-gate columns by 2 (exact in fp) so the
    # recurrence needs a single full-vreg sigmoid per step.
    gscale = jnp.ones((G,), jnp.float32).at[2 * H:3 * H].set(2.0)
    wx_s = wx * gscale
    wh_s = wh * gscale
    b_s = b * gscale

    # Lane-pad the classifier so loads/stores are unmasked and the output is lane-dense.
    w2_pad = jnp.zeros((F1, G), jnp.float32).at[:, :C].set(w2)
    b2_pad = jnp.zeros((1, G), jnp.float32).at[:, :C].set(b2)

    w_slab = jnp.concatenate([wx_s, wh_s, w1, w2_pad], axis=0)   # (D + 2H + F1, 4H)
    b_slab = jnp.concatenate([b_s, b1, b2_pad], axis=0)          # (3, 4H)

    return {"w": w_slab, "b": b_slab, "dims": (D, H, F1, C)}


def lstm1_forward(x, packed):
    """x: (B, T, D) float32, batch_first (same interface as the PyTorch module)."""
    B, T, D = x.shape
    Dp, H, F1, C = packed["dims"]
    assert D == Dp
    assert B % 8 == 0, "pad the batch to a multiple of 8 (f32 sublane count)"
    G = 4 * H

    # Layout munging in the wrapper: time-major 2-D (T*B, D) so each timestep is a contiguous,
    # sublane-aligned 8-row block of the hoisted projection inside the kernel.
    x_2d = jnp.transpose(x, (1, 0, 2)).reshape(T * B, D)

    vmem = pl.BlockSpec(memory_space=pltpu.MemorySpace.VMEM)
    out_pad = pl.pallas_call(
        _make_kernel(T, B, D, H, F1),
        out_shape=jax.ShapeDtypeStruct((B, G), jnp.float32),
        in_specs=[vmem, vmem, vmem],
        out_specs=vmem,
    )(x_2d, packed["w"], packed["b"])
    return out_pad[:, :C]


def init_params(key, input_size, hidden_size, fc1_size, num_classes):
    """Deterministic init mimicking PyTorch's U(-1/sqrt(fan), 1/sqrt(fan)); logical layout."""
    ks = jax.random.split(key, 10)
    kH = 1.0 / jnp.sqrt(hidden_size)
    k1 = 1.0 / jnp.sqrt(hidden_size)   # fc_1 fan_in = hidden_size
    k2 = 1.0 / jnp.sqrt(fc1_size)      # fc   fan_in = 128

    u = lambda k, shape, lim: jax.random.uniform(k, shape, jnp.float32, -lim, lim)

    w_ih = u(ks[0], (4 * hidden_size, input_size), kH)    # PyTorch layout (4H, D)
    w_hh = u(ks[1], (4 * hidden_size, hidden_size), kH)
    b_ih = u(ks[2], (4 * hidden_size,), kH)
    b_hh = u(ks[3], (4 * hidden_size,), kH)
    w_fc1 = u(ks[4], (fc1_size, hidden_size), k1)         # PyTorch layout (out, in)
    b_fc1 = u(ks[5], (fc1_size,), k1)
    w_fc = u(ks[6], (num_classes, fc1_size), k2)
    b_fc = u(ks[7], (num_classes,), k2)

    return {
        "wx": w_ih.T,                                      # (D, 4H)
        "wh": w_hh.T,                                      # (H, 4H)
        "b": (b_ih + b_hh)[None, :],                       # (1, 4H)
        "w1": w_fc1.T,                                     # (H, 128)
        "b1": b_fc1[None, :],                              # (1, 128)
        "w2": w_fc.T,                                      # (128, C)
        "b2": b_fc[None, :],                               # (1, C)
    }


def lstm1_reference(x, params):
    """Pure-JAX reference of the same forward pass (unpacked/unscaled params)."""
    B, T, D = x.shape
    H = params["wh"].shape[0]
    h = jnp.zeros((B, H), jnp.float32)
    c = jnp.zeros((B, H), jnp.float32)

    def step(carry, x_t):
        h, c = carry
        gates = x_t @ params["wx"] + h @ params["wh"] + params["b"]
        i = jax.nn.sigmoid(gates[:, 0 * H:1 * H])
        f = jax.nn.sigmoid(gates[:, 1 * H:2 * H])
        g = jnp.tanh(gates[:, 2 * H:3 * H])
        o = jax.nn.sigmoid(gates[:, 3 * H:4 * H])
        c = f * c + i * g
        h = o * jnp.tanh(c)
        return (h, c), None

    (h, c), _ = jax.lax.scan(step, (h, c), jnp.transpose(x, (1, 0, 2)))
    out = jnp.maximum(h, 0.0)
    out = jnp.maximum(out @ params["w1"] + params["b1"], 0.0)
    return out @ params["w2"] + params["b2"]


if __name__ == "__main__":
    # Small shapes consistent with the module: batch=8, seq=8, input_size=16,
    # hidden_size=32, fc_1 -> 128, num_classes=10.
    B, T, D = 8, 8, 16
    H, F1, C = 32, 128, 10

    key = jax.random.PRNGKey(0)
    k_x, k_p = jax.random.split(key)
    x = jax.random.normal(k_x, (B, T, D), jnp.float32)
    params = init_params(k_p, D, H, F1, C)
    packed = pack_params(params)

    out = lstm1_forward(x, packed)
    out = jax.block_until_ready(out)

    ref = lstm1_reference(x, params)
    assert out.shape == (B, C)
    assert jnp.allclose(out, ref, atol=1e-4, rtol=1e-4), "mismatch vs pure-JAX reference"

    print("KERNEL_OK")
</pallas_src>

<mosaic_0001>
module attributes {stable_mosaic.version = 11 : i64} {
  func.func @kernel(%arg0: memref<64x16xf32, #tpu.memory_space<vmem>>, %arg1: memref<208x128xf32, #tpu.memory_space<vmem>>, %arg2: memref<3x128xf32, #tpu.memory_space<vmem>>, %arg3: memref<8x128xf32, #tpu.memory_space<vmem>>) attributes {dimension_semantics = [], scalar_prefetch = 0 : i64, scratch_operands = 0 : i64, tpu.core_type = #tpu.core_type<tc>} {
    %c0 = arith.constant 0 : index
    %c0_0 = arith.constant 0 : index
    %0 = vector.load %arg1[%c0, %c0_0] : memref<208x128xf32, #tpu.memory_space<vmem>>, vector<16x128xf32>
    %c16 = arith.constant 16 : index
    %c0_1 = arith.constant 0 : index
    %1 = vector.load %arg1[%c16, %c0_1] : memref<208x128xf32, #tpu.memory_space<vmem>>, vector<32x128xf32>
    %c48 = arith.constant 48 : index
    %c0_2 = arith.constant 0 : index
    %2 = vector.load %arg1[%c48, %c0_2] : memref<208x128xf32, #tpu.memory_space<vmem>>, vector<32x128xf32>
    %c80 = arith.constant 80 : index
    %c0_3 = arith.constant 0 : index
    %3 = vector.load %arg1[%c80, %c0_3] : memref<208x128xf32, #tpu.memory_space<vmem>>, vector<128x128xf32>
    %c0_4 = arith.constant 0 : index
    %c0_5 = arith.constant 0 : index
    %4 = vector.load %arg2[%c0_4, %c0_5] : memref<3x128xf32, #tpu.memory_space<vmem>>, vector<3x128xf32>
    %5 = vector.extract_strided_slice %4 {offsets = [0, 0], sizes = [1, 128], strides = [1, 1]} : vector<3x128xf32> to vector<1x128xf32>
    %6 = vector.extract_strided_slice %4 {offsets = [1, 0], sizes = [1, 128], strides = [1, 1]} : vector<3x128xf32> to vector<1x128xf32>
    %7 = vector.extract_strided_slice %4 {offsets = [2, 0], sizes = [1, 128], strides = [1, 1]} : vector<3x128xf32> to vector<1x128xf32>
    %c0_6 = arith.constant 0 : index
    %c0_7 = arith.constant 0 : index
    %8 = vector.load %arg0[%c0_6, %c0_7] : memref<64x16xf32, #tpu.memory_space<vmem>>, vector<64x16xf32>
    %cst = arith.constant dense<0.000000e+00> : vector<64x128xf32>
    %9 = tpu.matmul %8, %0, %cst {dimension_numbers = #tpu.dot_dimension_numbers<[1], [0], [0], [1], [0, 0, 1, 1], [], []>} : vector<64x16xf32>, vector<16x128xf32>, vector<64x128xf32> -> vector<64x128xf32>
    %10 = vector.broadcast %5 : vector<1x128xf32> to vector<64x128xf32>
    %11 = arith.addf %9, %10 : vector<64x128xf32>
    %12 = tpu.iota {dimensions = array<i32: 1>} : vector<8x128xi32>
    %c64_i32 = arith.constant 64 : i32
    %13 = vector.broadcast %c64_i32 : i32 to vector<8x128xi32>
    %14 = arith.cmpi sge, %12, %13 : vector<8x128xi32>
    %c96_i32 = arith.constant 96 : i32
    %15 = vector.broadcast %c96_i32 : i32 to vector<8x128xi32>
    %16 = arith.cmpi slt, %12, %15 : vector<8x128xi32>
    %17 = arith.andi %14, %16 : vector<8x128xi1>
    %cst_8 = arith.constant 0.000000e+00 : f32
    %18 = vector.broadcast %cst_8 : f32 to vector<8x32xf32>
    %cst_9 = arith.constant 0.000000e+00 : f32
    %19 = vector.broadcast %cst_9 : f32 to vector<8x32xf32>
    %20 = vector.extract_strided_slice %11 {offsets = [0, 0], sizes = [8, 128], strides = [1, 1]} : vector<64x128xf32> to vector<8x128xf32>
    %cst_10 = arith.constant dense<0.000000e+00> : vector<8x128xf32>
    %21 = tpu.matmul %18, %1, %cst_10 {dimension_numbers = #tpu.dot_dimension_numbers<[1], [0], [0], [1], [0, 0, 1, 1], [], []>} : vector<8x32xf32>, vector<32x128xf32>, vector<8x128xf32> -> vector<8x128xf32>
    %22 = arith.addf %20, %21 : vector<8x128xf32>
    %23 = arith.negf %22 : vector<8x128xf32>
    %24 = math.exp %23 : vector<8x128xf32>
    %cst_11 = arith.constant 1.000000e+00 : f32
    %25 = vector.broadcast %cst_11 : f32 to vector<8x128xf32>
    %26 = arith.addf %25, %24 : vector<8x128xf32>
    %27 = arith.divf %25, %26 : vector<8x128xf32>
    %cst_12 = arith.constant 2.000000e+00 : f32
    %28 = vector.broadcast %cst_12 : f32 to vector<8x128xf32>
    %29 = arith.mulf %28, %27 : vector<8x128xf32>
    %cst_13 = arith.constant 1.000000e+00 : f32
    %30 = vector.broadcast %cst_13 : f32 to vector<8x128xf32>
    %31 = arith.subf %29, %30 : vector<8x128xf32>
    %32 = arith.select %17, %31, %27 : vector<8x128xi1>, vector<8x128xf32>
    %33 = vector.extract_strided_slice %32 {offsets = [0, 0], sizes = [8, 32], strides = [1, 1]} : vector<8x128xf32> to vector<8x32xf32>
    %34 = vector.extract_strided_slice %32 {offsets = [0, 32], sizes = [8, 32], strides = [1, 1]} : vector<8x128xf32> to vector<8x32xf32>
    %35 = vector.extract_strided_slice %32 {offsets = [0, 64], sizes = [8, 32], strides = [1, 1]} : vector<8x128xf32> to vector<8x32xf32>
    %36 = vector.extract_strided_slice %32 {offsets = [0, 96], sizes = [8, 32], strides = [1, 1]} : vector<8x128xf32> to vector<8x32xf32>
    %37 = arith.mulf %34, %19 : vector<8x32xf32>
    %38 = arith.mulf %33, %35 : vector<8x32xf32>
    %39 = arith.addf %37, %38 : vector<8x32xf32>
    %40 = math.tanh %39 : vector<8x32xf32>
    %41 = arith.mulf %36, %40 : vector<8x32xf32>
    %42 = vector.extract_strided_slice %11 {offsets = [8, 0], sizes = [8, 128], strides = [1, 1]} : vector<64x128xf32> to vector<8x128xf32>
    %cst_14 = arith.constant dense<0.000000e+00> : vector<8x128xf32>
    %43 = tpu.matmul %41, %1, %cst_14 {dimension_numbers = #tpu.dot_dimension_numbers<[1], [0], [0], [1], [0, 0, 1, 1], [], []>} : vector<8x32xf32>, vector<32x128xf32>, vector<8x128xf32> -> vector<8x128xf32>
    %44 = arith.addf %42, %43 : vector<8x128xf32>
    %45 = arith.negf %44 : vector<8x128xf32>
    %46 = math.exp %45 : vector<8x128xf32>
    %cst_15 = arith.constant 1.000000e+00 : f32
    %47 = vector.broadcast %cst_15 : f32 to vector<8x128xf32>
    %48 = arith.addf %47, %46 : vector<8x128xf32>
    %49 = arith.divf %47, %48 : vector<8x128xf32>
    %cst_16 = arith.constant 2.000000e+00 : f32
    %50 = vector.broadcast %cst_16 : f32 to vector<8x128xf32>
    %51 = arith.mulf %50, %49 : vector<8x128xf32>
    %cst_17 = arith.constant 1.000000e+00 : f32
    %52 = vector.broadcast %cst_17 : f32 to vector<8x128xf32>
    %53 = arith.subf %51, %52 : vector<8x128xf32>
    %54 = arith.select %17, %53, %49 : vector<8x128xi1>, vector<8x128xf32>
    %55 = vector.extract_strided_slice %54 {offsets = [0, 0], sizes = [8, 32], strides = [1, 1]} : vector<8x128xf32> to vector<8x32xf32>
    %56 = vector.extract_strided_slice %54 {offsets = [0, 32], sizes = [8, 32], strides = [1, 1]} : vector<8x128xf32> to vector<8x32xf32>
    %57 = vector.extract_strided_slice %54 {offsets = [0, 64], sizes = [8, 32], strides = [1, 1]} : vector<8x128xf32> to vector<8x32xf32>
    %58 = vector.extract_strided_slice %54 {offsets = [0, 96], sizes = [8, 32], strides = [1, 1]} : vector<8x128xf32> to vector<8x32xf32>
    %59 = arith.mulf %56, %39 : vector<8x32xf32>
    %60 = arith.mulf %55, %57 : vector<8x32xf32>
    %61 = arith.addf %59, %60 : vector<8x32xf32>
    %62 = math.tanh %61 : vector<8x32xf32>
    %63 = arith.mulf %58, %62 : vector<8x32xf32>
    %64 = vector.extract_strided_slice %11 {offsets = [16, 0], sizes = [8, 128], strides = [1, 1]} : vector<64x128xf32> to vector<8x128xf32>
    %cst_18 = arith.constant dense<0.000000e+00> : vector<8x128xf32>
    %65 = tpu.matmul %63, %1, %cst_18 {dimension_numbers = #tpu.dot_dimension_numbers<[1], [0], [0], [1], [0, 0, 1, 1], [], []>} : vector<8x32xf32>, vector<32x128xf32>, vector<8x128xf32> -> vector<8x128xf32>
    %66 = arith.addf %64, %65 : vector<8x128xf32>
    %67 = arith.negf %66 : vector<8x128xf32>
    %68 = math.exp %67 : vector<8x128xf32>
    %cst_19 = arith.constant 1.000000e+00 : f32
    %69 = vector.broadcast %cst_19 : f32 to vector<8x128xf32>
    %70 = arith.addf %69, %68 : vector<8x128xf32>
    %71 = arith.divf %69, %70 : vector<8x128xf32>
    %cst_20 = arith.constant 2.000000e+00 : f32
    %72 = vector.broadcast %cst_20 : f32 to vector<8x128xf32>
    %73 = arith.mulf %72, %71 : vector<8x128xf32>
    %cst_21 = arith.constant 1.000000e+00 : f32
    %74 = vector.broadcast %cst_21 : f32 to vector<8x128xf32>
    %75 = arith.subf %73, %74 : vector<8x128xf32>
    %76 = arith.select %17, %75, %71 : vector<8x128xi1>, vector<8x128xf32>
    %77 = vector.extract_strided_slice %76 {offsets = [0, 0], sizes = [8, 32], strides = [1, 1]} : vector<8x128xf32> to vector<8x32xf32>
    %78 = vector.extract_strided_slice %76 {offsets = [0, 32], sizes = [8, 32], strides = [1, 1]} : vector<8x128xf32> to vector<8x32xf32>
    %79 = vector.extract_strided_slice %76 {offsets = [0, 64], sizes = [8, 32], strides = [1, 1]} : vector<8x128xf32> to vector<8x32xf32>
    %80 = vector.extract_strided_slice %76 {offsets = [0, 96], sizes = [8, 32], strides = [1, 1]} : vector<8x128xf32> to vector<8x32xf32>
    %81 = arith.mulf %78, %61 : vector<8x32xf32>
    %82 = arith.mulf %77, %79 : vector<8x32xf32>
    %83 = arith.addf %81, %82 : vector<8x32xf32>
    %84 = math.tanh %83 : vector<8x32xf32>
    %85 = arith.mulf %80, %84 : vector<8x32xf32>
    %86 = vector.extract_strided_slice %11 {offsets = [24, 0], sizes = [8, 128], strides = [1, 1]} : vector<64x128xf32> to vector<8x128xf32>
    %cst_22 = arith.constant dense<0.000000e+00> : vector<8x128xf32>
    %87 = tpu.matmul %85, %1, %cst_22 {dimension_numbers = #tpu.dot_dimension_numbers<[1], [0], [0], [1], [0, 0, 1, 1], [], []>} : vector<8x32xf32>, vector<32x128xf32>, vector<8x128xf32> -> vector<8x128xf32>
    %88 = arith.addf %86, %87 : vector<8x128xf32>
    %89 = arith.negf %88 : vector<8x128xf32>
    %90 = math.exp %89 : vector<8x128xf32>
    %cst_23 = arith.constant 1.000000e+00 : f32
    %91 = vector.broadcast %cst_23 : f32 to vector<8x128xf32>
    %92 = arith.addf %91, %90 : vector<8x128xf32>
    %93 = arith.divf %91, %92 : vector<8x128xf32>
    %cst_24 = arith.constant 2.000000e+00 : f32
    %94 = vector.broadcast %cst_24 : f32 to vector<8x128xf32>
    %95 = arith.mulf %94, %93 : vector<8x128xf32>
    %cst_25 = arith.constant 1.000000e+00 : f32
    %96 = vector.broadcast %cst_25 : f32 to vector<8x128xf32>
    %97 = arith.subf %95, %96 : vector<8x128xf32>
    %98 = arith.select %17, %97, %93 : vector<8x128xi1>, vector<8x128xf32>
    %99 = vector.extract_strided_slice %98 {offsets = [0, 0], sizes = [8, 32], strides = [1, 1]} : vector<8x128xf32> to vector<8x32xf32>
    %100 = vector.extract_strided_slice %98 {offsets = [0, 32], sizes = [8, 32], strides = [1, 1]} : vector<8x128xf32> to vector<8x32xf32>
    %101 = vector.extract_strided_slice %98 {offsets = [0, 64], sizes = [8, 32], strides = [1, 1]} : vector<8x128xf32> to vector<8x32xf32>
    %102 = vector.extract_strided_slice %98 {offsets = [0, 96], sizes = [8, 32], strides = [1, 1]} : vector<8x128xf32> to vector<8x32xf32>
    %103 = arith.mulf %100, %83 : vector<8x32xf32>
    %104 = arith.mulf %99, %101 : vector<8x32xf32>
    %105 = arith.addf %103, %104 : vector<8x32xf32>
    %106 = math.tanh %105 : vector<8x32xf32>
    %107 = arith.mulf %102, %106 : vector<8x32xf32>
    %108 = vector.extract_strided_slice %11 {offsets = [32, 0], sizes = [8, 128], strides = [1, 1]} : vector<64x128xf32> to vector<8x128xf32>
    %cst_26 = arith.constant dense<0.000000e+00> : vector<8x128xf32>
    %109 = tpu.matmul %107, %1, %cst_26 {dimension_numbers = #tpu.dot_dimension_numbers<[1], [0], [0], [1], [0, 0, 1, 1], [], []>} : vector<8x32xf32>, vector<32x128xf32>, vector<8x128xf32> -> vector<8x128xf32>
    %110 = arith.addf %108, %109 : vector<8x128xf32>
    %111 = arith.negf %110 : vector<8x128xf32>
    %112 = math.exp %111 : vector<8x128xf32>
    %cst_27 = arith.constant 1.000000e+00 : f32
    %113 = vector.broadcast %cst_27 : f32 to vector<8x128xf32>
    %114 = arith.addf %113, %112 : vector<8x128xf32>
    %115 = arith.divf %113, %114 : vector<8x128xf32>
    %cst_28 = arith.constant 2.000000e+00 : f32
    %116 = vector.broadcast %cst_28 : f32 to vector<8x128xf32>
    %117 = arith.mulf %116, %115 : vector<8x128xf32>
    %cst_29 = arith.constant 1.000000e+00 : f32
    %118 = vector.broadcast %cst_29 : f32 to vector<8x128xf32>
    %119 = arith.subf %117, %118 : vector<8x128xf32>
    %120 = arith.select %17, %119, %115 : vector<8x128xi1>, vector<8x128xf32>
    %121 = vector.extract_strided_slice %120 {offsets = [0, 0], sizes = [8, 32], strides = [1, 1]} : vector<8x128xf32> to vector<8x32xf32>
    %122 = vector.extract_strided_slice %120 {offsets = [0, 32], sizes = [8, 32], strides = [1, 1]} : vector<8x128xf32> to vector<8x32xf32>
    %123 = vector.extract_strided_slice %120 {offsets = [0, 64], sizes = [8, 32], strides = [1, 1]} : vector<8x128xf32> to vector<8x32xf32>
    %124 = vector.extract_strided_slice %120 {offsets = [0, 96], sizes = [8, 32], strides = [1, 1]} : vector<8x128xf32> to vector<8x32xf32>
    %125 = arith.mulf %122, %105 : vector<8x32xf32>
    %126 = arith.mulf %121, %123 : vector<8x32xf32>
    %127 = arith.addf %125, %126 : vector<8x32xf32>
    %128 = math.tanh %127 : vector<8x32xf32>
    %129 = arith.mulf %124, %128 : vector<8x32xf32>
    %130 = vector.extract_strided_slice %11 {offsets = [40, 0], sizes = [8, 128], strides = [1, 1]} : vector<64x128xf32> to vector<8x128xf32>
    %cst_30 = arith.constant dense<0.000000e+00> : vector<8x128xf32>
    %131 = tpu.matmul %129, %1, %cst_30 {dimension_numbers = #tpu.dot_dimension_numbers<[1], [0], [0], [1], [0, 0, 1, 1], [], []>} : vector<8x32xf32>, vector<32x128xf32>, vector<8x128xf32> -> vector<8x128xf32>
    %132 = arith.addf %130, %131 : vector<8x128xf32>
    %133 = arith.negf %132 : vector<8x128xf32>
    %134 = math.exp %133 : vector<8x128xf32>
    %cst_31 = arith.constant 1.000000e+00 : f32
    %135 = vector.broadcast %cst_31 : f32 to vector<8x128xf32>
    %136 = arith.addf %135, %134 : vector<8x128xf32>
    %137 = arith.divf %135, %136 : vector<8x128xf32>
    %cst_32 = arith.constant 2.000000e+00 : f32
    %138 = vector.broadcast %cst_32 : f32 to vector<8x128xf32>
    %139 = arith.mulf %138, %137 : vector<8x128xf32>
    %cst_33 = arith.constant 1.000000e+00 : f32
    %140 = vector.broadcast %cst_33 : f32 to vector<8x128xf32>
    %141 = arith.subf %139, %140 : vector<8x128xf32>
    %142 = arith.select %17, %141, %137 : vector<8x128xi1>, vector<8x128xf32>
    %143 = vector.extract_strided_slice %142 {offsets = [0, 0], sizes = [8, 32], strides = [1, 1]} : vector<8x128xf32> to vector<8x32xf32>
    %144 = vector.extract_strided_slice %142 {offsets = [0, 32], sizes = [8, 32], strides = [1, 1]} : vector<8x128xf32> to vector<8x32xf32>
    %145 = vector.extract_strided_slice %142 {offsets = [0, 64], sizes = [8, 32], strides = [1, 1]} : vector<8x128xf32> to vector<8x32xf32>
    %146 = vector.extract_strided_slice %142 {offsets = [0, 96], sizes = [8, 32], strides = [1, 1]} : vector<8x128xf32> to vector<8x32xf32>
    %147 = arith.mulf %144, %127 : vector<8x32xf32>
    %148 = arith.mulf %143, %145 : vector<8x32xf32>
    %149 = arith.addf %147, %148 : vector<8x32xf32>
    %150 = math.tanh %149 : vector<8x32xf32>
    %151 = arith.mulf %146, %150 : vector<8x32xf32>
    %152 = vector.extract_strided_slice %11 {offsets = [48, 0], sizes = [8, 128], strides = [1, 1]} : vector<64x128xf32> to vector<8x128xf32>
    %cst_34 = arith.constant dense<0.000000e+00> : vector<8x128xf32>
    %153 = tpu.matmul %151, %1, %cst_34 {dimension_numbers = #tpu.dot_dimension_numbers<[1], [0], [0], [1], [0, 0, 1, 1], [], []>} : vector<8x32xf32>, vector<32x128xf32>, vector<8x128xf32> -> vector<8x128xf32>
    %154 = arith.addf %152, %153 : vector<8x128xf32>
    %155 = arith.negf %154 : vector<8x128xf32>
    %156 = math.exp %155 : vector<8x128xf32>
    %cst_35 = arith.constant 1.000000e+00 : f32
    %157 = vector.broadcast %cst_35 : f32 to vector<8x128xf32>
    %158 = arith.addf %157, %156 : vector<8x128xf32>
    %159 = arith.divf %157, %158 : vector<8x128xf32>
    %cst_36 = arith.constant 2.000000e+00 : f32
    %160 = vector.broadcast %cst_36 : f32 to vector<8x128xf32>
    %161 = arith.mulf %160, %159 : vector<8x128xf32>
    %cst_37 = arith.constant 1.000000e+00 : f32
    %162 = vector.broadcast %cst_37 : f32 to vector<8x128xf32>
    %163 = arith.subf %161, %162 : vector<8x128xf32>
    %164 = arith.select %17, %163, %159 : vector<8x128xi1>, vector<8x128xf32>
    %165 = vector.extract_strided_slice %164 {offsets = [0, 0], sizes = [8, 32], strides = [1, 1]} : vector<8x128xf32> to vector<8x32xf32>
    %166 = vector.extract_strided_slice %164 {offsets = [0, 32], sizes = [8, 32], strides = [1, 1]} : vector<8x128xf32> to vector<8x32xf32>
    %167 = vector.extract_strided_slice %164 {offsets = [0, 64], sizes = [8, 32], strides = [1, 1]} : vector<8x128xf32> to vector<8x32xf32>
    %168 = vector.extract_strided_slice %164 {offsets = [0, 96], sizes = [8, 32], strides = [1, 1]} : vector<8x128xf32> to vector<8x32xf32>
    %169 = arith.mulf %166, %149 : vector<8x32xf32>
    %170 = arith.mulf %165, %167 : vector<8x32xf32>
    %171 = arith.addf %169, %170 : vector<8x32xf32>
    %172 = math.tanh %171 : vector<8x32xf32>
    %173 = arith.mulf %168, %172 : vector<8x32xf32>
    %174 = vector.extract_strided_slice %11 {offsets = [56, 0], sizes = [8, 128], strides = [1, 1]} : vector<64x128xf32> to vector<8x128xf32>
    %cst_38 = arith.constant dense<0.000000e+00> : vector<8x128xf32>
    %175 = tpu.matmul %173, %1, %cst_38 {dimension_numbers = #tpu.dot_dimension_numbers<[1], [0], [0], [1], [0, 0, 1, 1], [], []>} : vector<8x32xf32>, vector<32x128xf32>, vector<8x128xf32> -> vector<8x128xf32>
    %176 = arith.addf %174, %175 : vector<8x128xf32>
    %177 = arith.negf %176 : vector<8x128xf32>
    %178 = math.exp %177 : vector<8x128xf32>
    %cst_39 = arith.constant 1.000000e+00 : f32
    %179 = vector.broadcast %cst_39 : f32 to vector<8x128xf32>
    %180 = arith.addf %179, %178 : vector<8x128xf32>
    %181 = arith.divf %179, %180 : vector<8x128xf32>
    %cst_40 = arith.constant 2.000000e+00 : f32
    %182 = vector.broadcast %cst_40 : f32 to vector<8x128xf32>
    %183 = arith.mulf %182, %181 : vector<8x128xf32>
    %cst_41 = arith.constant 1.000000e+00 : f32
    %184 = vector.broadcast %cst_41 : f32 to vector<8x128xf32>
    %185 = arith.subf %183, %184 : vector<8x128xf32>
    %186 = arith.select %17, %185, %181 : vector<8x128xi1>, vector<8x128xf32>
    %187 = vector.extract_strided_slice %186 {offsets = [0, 0], sizes = [8, 32], strides = [1, 1]} : vector<8x128xf32> to vector<8x32xf32>
    %188 = vector.extract_strided_slice %186 {offsets = [0, 32], sizes = [8, 32], strides = [1, 1]} : vector<8x128xf32> to vector<8x32xf32>
    %189 = vector.extract_strided_slice %186 {offsets = [0, 64], sizes = [8, 32], strides = [1, 1]} : vector<8x128xf32> to vector<8x32xf32>
    %190 = vector.extract_strided_slice %186 {offsets = [0, 96], sizes = [8, 32], strides = [1, 1]} : vector<8x128xf32> to vector<8x32xf32>
    %191 = arith.mulf %188, %171 : vector<8x32xf32>
    %192 = arith.mulf %187, %189 : vector<8x32xf32>
    %193 = arith.addf %191, %192 : vector<8x32xf32>
    %194 = math.tanh %193 : vector<8x32xf32>
    %195 = arith.mulf %190, %194 : vector<8x32xf32>
    %cst_42 = arith.constant 0.000000e+00 : f32
    %196 = vector.broadcast %cst_42 : f32 to vector<8x32xf32>
    %197 = arith.maximumf %195, %196 : vector<8x32xf32>
    %cst_43 = arith.constant dense<0.000000e+00> : vector<8x128xf32>
    %198 = tpu.matmul %197, %2, %cst_43 {dimension_numbers = #tpu.dot_dimension_numbers<[1], [0], [0], [1], [0, 0, 1, 1], [], []>} : vector<8x32xf32>, vector<32x128xf32>, vector<8x128xf32> -> vector<8x128xf32>
    %199 = vector.broadcast %6 : vector<1x128xf32> to vector<8x128xf32>
    %200 = arith.addf %198, %199 : vector<8x128xf32>
    %cst_44 = arith.constant 0.000000e+00 : f32
    %201 = vector.broadcast %cst_44 : f32 to vector<8x128xf32>
    %202 = arith.maximumf %200, %201 : vector<8x128xf32>
    %cst_45 = arith.constant dense<0.000000e+00> : vector<8x128xf32>
    %203 = tpu.matmul %202, %3, %cst_45 {dimension_numbers = #tpu.dot_dimension_numbers<[1], [0], [0], [1], [0, 0, 1, 1], [], []>} : vector<8x128xf32>, vector<128x128xf32>, vector<8x128xf32> -> vector<8x128xf32>
    %204 = vector.broadcast %7 : vector<1x128xf32> to vector<8x128xf32>
    %205 = arith.addf %203, %204 : vector<8x128xf32>
    %c0_46 = arith.constant 0 : index
    %c0_47 = arith.constant 0 : index
    %206 = vector.load %arg3[%c0_46, %c0_47] : memref<8x128xf32, #tpu.memory_space<vmem>>, vector<8x128xf32>
    tpu.vector_store %arg3[%c0_46, %c0_47], %205 {strides = array<i32>} : memref<8x128xf32, #tpu.memory_space<vmem>>, vector<8x128xf32>,
    return
  }
}

</mosaic_0001>

<bundles_post_ra>
// kernel: tpu_custom_call.1
= control target key start
LH: loop header
LB: loop body
LE: loop exit
PB: predicated region body
PF: predicated region fallthrough
CT: control target
= control target key end

     0   :  { %8 = vsyncpa [#allocation3], 0  ;;  %s1054_s0 = inlined_call_operand.vmem [shape: f32[64,16], index: 0, kind: input, shape index: {}]   ;;  %s1055_s1 = inlined_call_operand.hbm [shape: f32[208,128], index: 1, kind: input, shape index: {}]   ;;  %s1056_s2 = inlined_call_operand.vmem [shape: f32[3,128], index: 2, kind: input, shape index: {}]   ;;  %s1057_s3 = inlined_call_operand.hbm [shape: f32[8,128], index: 3, kind: output, shape index: {}]  }
   0x1   :  { %9 = vsyncpa [#allocation4], 0  ;;  %s16_s14 = sshll.u32 %s1055_s1, 4  ;;  %s865_s15 = smov [#allocation2]   ;;  %s17_s14 = int_to_ptr.hbm [resolvable:$true] %s16_s14 }
   0x2   :  { %s18_s16 = sshll.u32 %s865_s15, 4  ;;  %s866_s17 = smov 128   ;;  %s19_s16 = int_to_ptr.vmem [resolvable:$true] %s18_s16 }
   0x3   :  { %s867_s18 = smov 8  }
   0x4   :  { %24 = dma.hbm_to_vmem [thread:$0]  %s17_s14, 3328, %s19_s16, [#allocation3], %s866_s17, %s866_s17, %s867_s18  }
   0x5   :  { %861 = dma.done.wait [#allocation3], 3328  }
   0x6   :  { %862 = vsyncadd [#allocation3], 4294963968  ;;  %v895_v0 = vld [vmem:[#allocation2 + $0x28] sm:$0xff]  ;;  %v897_v1 = vld [vmem:[#allocation2 + $0x20] sm:$0xff]  ;;  %vm67_vm0 = vcmask 130048   ;;  %v868_v7 = vmov 0.0   ;;  %v133_v19 = vlaneseq }
   0x7   :  { %154 = vmatpush.msra.mxu3 %v895_v0  ;;  %v32_v2 = vld [vmem:[#allocation2 + $0x8] sm:$0xff]  ;;  %v31_v3 = vld [vmem:[#allocation2] sm:$0xff]  ;;  %544 = vmatpush.msra.mxu1 %v895_v0  ;;  %v901_v4 = vld [vmem:[#allocation2 + $0x18] sm:$0xff]  ;;  %s870_s22 = smov 32   ;;  %vm138_vm8 = vcmask 261120   ;;  %s714_s13 = sshll.u32 %s1057_s3, 4  ;;  %s715_s13 = int_to_ptr.hbm [resolvable:$true] %s714_s13 }
   0x8   :  { %106 = vmatpush.msra.mxu0 %v32_v2  ;;  %v58_v5 = vld [vmem:[%s1054_s0] sm:$0xff]  ;;  %756 = vmatpush.msra.mxu2 %v32_v2  ;;  %v908_v6 = vld [vmem:[#allocation2 + $0x10] sm:$0xff]  ;;  %v134_v22 = vand.u32 127, %v133_v19  ;;  %v65_v40 = vld [vmem:[%s1054_s0 + $0x38] sm:$0xff] }
   0x9   :  { %155 = vmatpush.msra.mxu3 %v897_v1  ;;  %545 = vmatpush.msra.mxu1 %v897_v1  ;;  %v930_v8 = vld [vmem:[%s1056_s2] sm:$0x7]  ;;  %s869_s2 = smov 64   ;;  %v64_v39 = vld [vmem:[%s1054_s0 + $0x30] sm:$0xff]  ;;  %v59_v43 = vld [vmem:[%s1054_s0 + $0x8] sm:$0xff] }
   0xa   :  { %107 = vmatpush.msra.mxu0 %v31_v3  ;;  %757 = vmatpush.msra.mxu2 %v31_v3  ;;  %v933_v9 = vperm.slane %v930_v8, 0  ;;  %vm135_vm4 = vcmp.ge.s32.totalorder %v134_v22, 64  ;;  %vm136_vm5 = vcmp.lt.s32.totalorder %v134_v22, 96  ;;  %v37_v30 = vld [vmem:[#allocation2 + $0x30] sm:$0xff] }
   0xb   :  { %156 = vmatpush.msra.mxu3 %v901_v4  ;;  %724 = vmatmul.msk.f32.vlgmr.msra.gmra.mxu0 %vm67_vm0, %v58_v5  ;;  %vm936_vm7 = vmand %vm135_vm4, %vm136_vm5 }
   0xc   :  { %219 = vmatpush.msrb.mxu2 %v895_v0  ;;  %546 = vmatpush.msra.mxu1 %v901_v4 }
   0xd   :  { %157 = vmatpush.msra.mxu3 %v908_v6  ;;  %730 = vmatmul.msk.f32.vlgmr.msra.gmra.mxu2 %vm67_vm0, %v64_v39 }
   0xe   :  { %158 = vmatmul.f32.vlgmr.msra.gmra.mxu3 %v868_v7  ;;  %220 = vmatpush.msrb.mxu2 %v897_v1 }
   0xf   :  { %284 = vmatpush.msrb.mxu3 %v895_v0  ;;  %547 = vmatpush.msra.mxu1 %v908_v6 }
  0x10   :  { %221 = vmatpush.msrb.mxu2 %v901_v4 }
  0x11   :  { %285 = vmatpush.msrb.mxu3 %v897_v1 }
  0x12   :  { %222 = vmatpush.msrb.mxu2 %v908_v6 }
  0x13   :  { %286 = vmatpush.msrb.mxu3 %v901_v4  ;;  %725 = vmatmul.msk.f32.gmra.mxu0 %vm67_vm0, %v59_v43 }
  0x14   :  { %414 = vmatpush.msra.mxu2 %v895_v0 }
  0x15   :  { %287 = vmatpush.msrb.mxu3 %v908_v6  ;;  %731 = vmatmul.msk.f32.gmra.mxu2 %vm67_vm0, %v65_v40 }
  0x16   :  { %415 = vmatpush.msra.mxu2 %v897_v1 }
  0x17   :  { %349 = vmatpush.msra.mxu3 %v895_v0 }
  0x18   :  { %416 = vmatpush.msra.mxu2 %v901_v4 }
  0x19   :  { %350 = vmatpush.msra.mxu3 %v897_v1 }
  0x1a   :  { %417 = vmatpush.msra.mxu2 %v908_v6 }
  0x1b   :  { %351 = vmatpush.msra.mxu3 %v901_v4 }
  0x1d   :  { %352 = vmatpush.msra.mxu3 %v908_v6 }
  0x88   :  { %v109_v10 = vpop.f32.mrf.mxu0 }
  0x89   :  { %v110_v11 = vadd.f32 %v109_v10, %v933_v9 }
  0x90   :  { %v967_v45 = vpop.f32.mrf.mxu2  ;;  %v112_v47 = vpop.f32.mrf.mxu0 }
  0x91   :  { %v159_v12 = vpop.f32.mrf.mxu3  ;;  %v113_v48 = vadd.f32 %v112_v47, %v933_v9 }
  0x92   :  { %v162_v13 = vadd.f32 %v159_v12, %v110_v11 }
  0x94   :  { %v732_v14 = vmul.f32 -1.442695, %v162_v13 }
  0x96   :  { %765 = vpow2.f32 %v732_v14 }
  0x98   :  { %v969_v46 = vpop.f32.mrf.mxu2 }
  0x9c   :  { %v766_v15 = vpop.eup %765 }
  0x9d   :  { %v166_v16 = vadd.f32 1.0, %v766_v15 }
  0x9f   :  { %767 = vrcp.f32 %v166_v16  ;;  %v178_v21 = vand.u32 2147483648, %v166_v16  ;;  %v176_v24 = vand.u32 2147483647, %v166_v16  ;;  %vm172_vm2 = vweird.f32 %v166_v16 }
  0xa1   :  { %v179_v26 = vor.u32 1.1754944e-38, %v178_v21  ;;  %vm177_vm6 = vcmp.eq.f32.partialorder %v176_v24, 8.507059e+37 }
  0xa5   :  { %v768_v17 = vpop.eup %767 }
  0xa6   :  { %v168_v18 = vmul.f32 %v768_v17, %v166_v16  ;;  %vm173_vm1 = vweird.f32 %v768_v17 }
  0xa7   :  { %vm174_vm3 = vmor %vm172_vm2, %vm173_vm1 }
  0xa8   :  { %v169_v20 = vsub.f32 1.0, %v168_v18 }
  0xaa   :  { %v170_v23 = vmul.f32 %v768_v17, %v169_v20 }
  0xac   :  { %v171_v25 = vadd.f32 %v768_v17, %v170_v23 }
  0xae   :  { %v175_v27 = vsel %vm174_vm3, %v768_v17, %v171_v25  ;;  %v60_v17 = vld [vmem:[%s1054_s0 + $0x10] sm:$0xff] }
  0xaf   :  { %v180_v28 = vsel %vm177_vm6, %v179_v26, %v175_v27  ;;  %726 = vmatmul.msk.f32.gmra.mxu0 %vm67_vm0, %v60_v17 }
  0xb0   :  { %v182_v29 = vmul.f32 2.0, %v180_v28 }
  0xb2   :  { %v733_v31 = vadd.f32 -1.0, %v182_v29 }
  0xb4   :  { %v184_v32 = vsel %vm936_vm7, %v733_v31, %v180_v28 }
  0xb5   :  { %187 = vrot.lane.b32.xlu0 %v184_v32, %s869_s2  ;;  %v185_v35 = vmul.f32 0.0, %v184_v32 }
 0x127   :  { %v188_v33 = vpop.permute.xlu0 %187 }
 0x128   :  { %v190_v34 = vmul.f32 %v188_v33, %v184_v32 }
 0x12a   :  { %192 = vrot.lane.b32.xlu0 %v190_v34, %s870_s22 }
 0x12c   :  { %v115_v19 = vpop.f32.mrf.mxu0 }
 0x12d   :  { %v116_v20 = vadd.f32 %v115_v19, %v933_v9 }
 0x19c   :  { %v193_v36 = vpop.permute.xlu0 %192 }
 0x19d   :  { %v195_v37 = vadd.f32 %v193_v36, %v185_v35 }
 0x19f   :  { %769 = vtanh.f32 %v195_v37 }
 0x1a5   :  { %v770_v38 = vpop.eup %769 }
 0x1a6   :  { %198 = vrot.lane.b32.xlu1 %v770_v38, %s869_s2 }
 0x218   :  { %v199_v41 = vpop.permute.xlu1 %198 }
 0x219   :  { %v201_v42 = vmul.f32 %v199_v41, %v184_v32 }
 0x21b   :  { %203 = vrot.lane.b32.xlu1 %v201_v42, %s870_s22 }
 0x28d   :  { %v204_v44 = vpop.permute.xlu1 %203 }
 0x28e   :  { %734 = vmatmul.msk.f32.vlgmr.msrb.gmra.mxu2 %vm138_vm8, %v204_v44  ;;  %v61_v44 = vld [vmem:[%s1054_s0 + $0x18] sm:$0xff] }
 0x28f   :  { %609 = vmatpush.msrb.mxu2 %v895_v0  ;;  %727 = vmatmul.msk.f32.gmra.mxu0 %vm67_vm0, %v61_v44 }
 0x291   :  { %610 = vmatpush.msrb.mxu2 %v897_v1 }
 0x293   :  { %611 = vmatpush.msrb.mxu2 %v901_v4 }
 0x295   :  { %612 = vmatpush.msrb.mxu2 %v908_v6 }
 0x311   :  { %v224_v49 = vpop.f32.mrf.mxu2 }
 0x312   :  { %v227_v50 = vadd.f32 %v224_v49, %v113_v48  ;;  %v118_v48 = vpop.f32.mrf.mxu0 }
 0x313   :  { %v119_v49 = vadd.f32 %v118_v48, %v933_v9 }
 0x314   :  { %v735_v51 = vmul.f32 -1.442695, %v227_v50 }
 0x316   :  { %771 = vpow2.f32 %v735_v51 }
 0x31c   :  { %v772_v52 = vpop.eup %771 }
 0x31d   :  { %v231_v53 = vadd.f32 1.0, %v772_v52 }
 0x31f   :  { %773 = vrcp.f32 %v231_v53  ;;  %v243_v57 = vand.u32 2147483648, %v231_v53  ;;  %v241_v59 = vand.u32 2147483647, %v231_v53  ;;  %vm237_vm10 = vweird.f32 %v231_v53 }
 0x321   :  { %v244_v61 = vor.u32 1.1754944e-38, %v243_v57  ;;  %vm242_vm12 = vcmp.eq.f32.partialorder %v241_v59, 8.507059e+37 }
 0x325   :  { %v774_v54 = vpop.eup %773 }
 0x326   :  { %v233_v55 = vmul.f32 %v774_v54, %v231_v53  ;;  %vm238_vm9 = vweird.f32 %v774_v54 }
 0x327   :  { %vm239_vm11 = vmor %vm237_vm10, %vm238_vm9 }
 0x328   :  { %v234_v56 = vsub.f32 1.0, %v233_v55 }
 0x32a   :  { %v235_v58 = vmul.f32 %v774_v54, %v234_v56 }
 0x32c   :  { %v236_v60 = vadd.f32 %v774_v54, %v235_v58 }
 0x32e   :  { %v240_v62 = vsel %vm239_vm11, %v774_v54, %v236_v60 }
 0x32f   :  { %v245_v63 = vsel %vm242_vm12, %v244_v61, %v240_v62 }
 0x330   :  { %v247_v2 = vmul.f32 2.0, %v245_v63 }
 0x332   :  { %v736_v3 = vadd.f32 -1.0, %v247_v2 }
 0x334   :  { %v249_v5 = vsel %vm936_vm7, %v736_v3, %v245_v63 }
 0x335   :  { %252 = vrot.lane.b32.xlu2 %v249_v5, %s869_s2  ;;  %v250_v11 = vmul.f32 %v249_v5, %v195_v37 }
 0x38f   :  { %v253_v7 = vpop.permute.xlu2 %252 }
 0x390   :  { %v255_v10 = vmul.f32 %v253_v7, %v249_v5 }
 0x392   :  { %257 = vrot.lane.b32.xlu2 %v255_v10, %s870_s22 }
 0x3ec   :  { %v258_v12 = vpop.permute.xlu2 %257 }
 0x3ed   :  { %v260_v13 = vadd.f32 %v258_v12, %v250_v11 }
 0x3ef   :  { %775 = vtanh.f32 %v260_v13 }
 0x3f5   :  { %v776_v14 = vpop.eup %775 }
 0x3f6   :  { %263 = vrot.lane.b32.xlu0 %v776_v14, %s869_s2 }
 0x468   :  { %v264_v15 = vpop.permute.xlu0 %263 }
 0x469   :  { %v266_v16 = vmul.f32 %v264_v15, %v249_v5 }
 0x46b   :  { %268 = vrot.lane.b32.xlu1 %v266_v16, %s870_s22 }
 0x4dd   :  { %v269_v18 = vpop.permute.xlu1 %268 }
 0x4de   :  { %737 = vmatmul.msk.f32.vlgmr.msrb.gmra.mxu3 %vm138_vm8, %v269_v18  ;;  %v62_v18 = vld [vmem:[%s1054_s0 + $0x20] sm:$0xff] }
 0x4df   :  { %479 = vmatpush.msrb.mxu3 %v895_v0  ;;  %728 = vmatmul.msk.f32.gmra.mxu0 %vm67_vm0, %v62_v18 }
 0x4e1   :  { %480 = vmatpush.msrb.mxu3 %v897_v1 }
 0x4e3   :  { %481 = vmatpush.msrb.mxu3 %v901_v4 }
 0x4e5   :  { %482 = vmatpush.msrb.mxu3 %v908_v6 }
 0x561   :  { %v289_v21 = vpop.f32.mrf.mxu3 }
 0x562   :  { %v292_v22 = vadd.f32 %v289_v21, %v116_v20  ;;  %v121_v20 = vpop.f32.mrf.mxu0 }
 0x563   :  { %v122_v21 = vadd.f32 %v121_v20, %v933_v9  ;;  %v128_v20 = vadd.f32 %v967_v45, %v933_v9 }
 0x564   :  { %v738_v23 = vmul.f32 -1.442695, %v292_v22 }
 0x566   :  { %777 = vpow2.f32 %v738_v23 }
 0x56c   :  { %v778_v24 = vpop.eup %777 }
 0x56d   :  { %v296_v25 = vadd.f32 1.0, %v778_v24 }
 0x56f   :  { %779 = vrcp.f32 %v296_v25  ;;  %v308_v0 = vand.u32 2147483648, %v296_v25  ;;  %v306_v1 = vand.u32 2147483647, %v296_v25  ;;  %vm302_vm14 = vweird.f32 %v296_v25 }
 0x571   :  { %v309_v6 = vor.u32 1.1754944e-38, %v308_v0  ;;  %vm307_vm1 = vcmp.eq.f32.partialorder %v306_v1, 8.507059e+37 }
 0x575   :  { %v780_v26 = vpop.eup %779 }
 0x576   :  { %v298_v27 = vmul.f32 %v780_v26, %v296_v25  ;;  %vm303_vm13 = vweird.f32 %v780_v26 }
 0x577   :  { %vm304_vm15 = vmor %vm302_vm14, %vm303_vm13 }
 0x578   :  { %v299_v28 = vsub.f32 1.0, %v298_v27 }
 0x57a   :  { %v300_v29 = vmul.f32 %v780_v26, %v299_v28 }
 0x57c   :  { %v301_v4 = vadd.f32 %v780_v26, %v300_v29 }
 0x57e   :  { %v305_v31 = vsel %vm304_vm15, %v780_v26, %v301_v4 }
 0x57f   :  { %v310_v32 = vsel %vm307_vm1, %v309_v6, %v305_v31 }
 0x580   :  { %v312_v33 = vmul.f32 2.0, %v310_v32 }
 0x582   :  { %v739_v34 = vadd.f32 -1.0, %v312_v33 }
 0x584   :  { %v314_v35 = vsel %vm936_vm7, %v739_v34, %v310_v32 }
 0x585   :  { %317 = vrot.lane.b32.xlu2 %v314_v35, %s869_s2  ;;  %v315_v38 = vmul.f32 %v314_v35, %v260_v13 }
 0x5df   :  { %v318_v36 = vpop.permute.xlu2 %317 }
 0x5e0   :  { %v320_v37 = vmul.f32 %v318_v36, %v314_v35 }
 0x5e2   :  { %322 = vrot.lane.b32.xlu0 %v320_v37, %s870_s22 }
 0x654   :  { %v323_v39 = vpop.permute.xlu0 %322 }
 0x655   :  { %v325_v40 = vadd.f32 %v323_v39, %v315_v38 }
 0x657   :  { %781 = vtanh.f32 %v325_v40 }
 0x65d   :  { %v782_v41 = vpop.eup %781 }
 0x65e   :  { %328 = vrot.lane.b32.xlu1 %v782_v41, %s869_s2 }
 0x6d0   :  { %v329_v42 = vpop.permute.xlu1 %328 }
 0x6d1   :  { %v331_v43 = vmul.f32 %v329_v42, %v314_v35 }
 0x6d3   :  { %333 = vrot.lane.b32.xlu2 %v331_v43, %s870_s22 }
 0x72d   :  { %v334_v47 = vpop.permute.xlu2 %333 }
 0x72e   :  { %740 = vmatmul.msk.f32.vlgmr.msra.gmra.mxu3 %vm138_vm8, %v334_v47  ;;  %v63_v47 = vld [vmem:[%s1054_s0 + $0x28] sm:$0xff]  ;;  %s871_s0 = smov [#allocation5]  }
 0x72f   :  { %729 = vmatmul.msk.f32.gmra.mxu0 %vm67_vm0, %v63_v47  ;;  %s712_s10 = sshll.u32 %s871_s0, 4  ;;  %s713_s10 = int_to_ptr.vmem [resolvable:$true] %s712_s10 }
 0x7b1   :  { %v354_v50 = vpop.f32.mrf.mxu3 }
 0x7b2   :  { %v357_v51 = vadd.f32 %v354_v50, %v119_v49  ;;  %v124_v49 = vpop.f32.mrf.mxu0 }
 0x7b3   :  { %v125_v50 = vadd.f32 %v124_v49, %v933_v9 }
 0x7b4   :  { %v741_v52 = vmul.f32 -1.442695, %v357_v51 }
 0x7b6   :  { %783 = vpow2.f32 %v741_v52 }
 0x7bc   :  { %v784_v53 = vpop.eup %783 }
 0x7bd   :  { %v361_v54 = vadd.f32 1.0, %v784_v53 }
 0x7bf   :  { %785 = vrcp.f32 %v361_v54  ;;  %v373_v58 = vand.u32 2147483648, %v361_v54  ;;  %v371_v60 = vand.u32 2147483647, %v361_v54  ;;  %vm367_vm3 = vweird.f32 %v361_v54 }
 0x7c1   :  { %v374_v62 = vor.u32 1.1754944e-38, %v373_v58  ;;  %vm372_vm5 = vcmp.eq.f32.partialorder %v371_v60, 8.507059e+37 }
 0x7c5   :  { %v786_v55 = vpop.eup %785 }
 0x7c6   :  { %v363_v56 = vmul.f32 %v786_v55, %v361_v54  ;;  %vm368_vm2 = vweird.f32 %v786_v55 }
 0x7c7   :  { %vm369_vm4 = vmor %vm367_vm3, %vm368_vm2 }
 0x7c8   :  { %v364_v57 = vsub.f32 1.0, %v363_v56 }
 0x7ca   :  { %v365_v59 = vmul.f32 %v786_v55, %v364_v57 }
 0x7cc   :  { %v366_v61 = vadd.f32 %v786_v55, %v365_v59 }
 0x7ce   :  { %v370_v63 = vsel %vm369_vm4, %v786_v55, %v366_v61 }
 0x7cf   :  { %v375_v2 = vsel %vm372_vm5, %v374_v62, %v370_v63 }
 0x7d0   :  { %v377_v3 = vmul.f32 2.0, %v375_v2 }
 0x7d2   :  { %v742_v5 = vadd.f32 -1.0, %v377_v3 }
 0x7d4   :  { %v379_v7 = vsel %vm936_vm7, %v742_v5, %v375_v2 }
 0x7d5   :  { %382 = vrot.lane.b32.xlu0 %v379_v7, %s869_s2  ;;  %v380_v12 = vmul.f32 %v379_v7, %v325_v40 }
 0x847   :  { %v383_v10 = vpop.permute.xlu0 %382 }
 0x848   :  { %v385_v11 = vmul.f32 %v383_v10, %v379_v7 }
 0x84a   :  { %387 = vrot.lane.b32.xlu1 %v385_v11, %s870_s22 }
 0x8bc   :  { %v388_v13 = vpop.permute.xlu1 %387 }
 0x8bd   :  { %v390_v14 = vadd.f32 %v388_v13, %v380_v12 }
 0x8bf   :  { %787 = vtanh.f32 %v390_v14 }
 0x8c5   :  { %v788_v15 = vpop.eup %787 }
 0x8c6   :  { %393 = vrot.lane.b32.xlu2 %v788_v15, %s869_s2 }
 0x920   :  { %v394_v16 = vpop.permute.xlu2 %393 }
 0x921   :  { %v396_v17 = vmul.f32 %v394_v16, %v379_v7 }
 0x923   :  { %398 = vrot.lane.b32.xlu0 %v396_v17, %s870_s22 }
 0x995   :  { %v399_v19 = vpop.permute.xlu0 %398 }
 0x996   :  { %743 = vmatmul.msk.f32.vlgmr.msra.gmra.mxu2 %vm138_vm8, %v399_v19 }
 0xa19   :  { %v419_v22 = vpop.f32.mrf.mxu2 }
 0xa1a   :  { %v422_v23 = vadd.f32 %v419_v22, %v122_v21 }
 0xa1c   :  { %v744_v24 = vmul.f32 -1.442695, %v422_v23 }
 0xa1e   :  { %789 = vpow2.f32 %v744_v24 }
 0xa24   :  { %v790_v25 = vpop.eup %789 }
 0xa25   :  { %v426_v26 = vadd.f32 1.0, %v790_v25 }
 0xa27   :  { %791 = vrcp.f32 %v426_v26  ;;  %v438_v29 = vand.u32 2147483648, %v426_v26  ;;  %v436_v4 = vand.u32 2147483647, %v426_v26  ;;  %vm432_vm9 = vweird.f32 %v426_v26 }
 0xa29   :  { %v439_v31 = vor.u32 1.1754944e-38, %v438_v29  ;;  %vm437_vm11 = vcmp.eq.f32.partialorder %v436_v4, 8.507059e+37 }
 0xa2d   :  { %v792_v27 = vpop.eup %791 }
 0xa2e   :  { %v428_v28 = vmul.f32 %v792_v27, %v426_v26  ;;  %vm433_vm6 = vweird.f32 %v792_v27 }
 0xa2f   :  { %vm434_vm10 = vmor %vm432_vm9, %vm433_vm6 }
 0xa30   :  { %v429_v0 = vsub.f32 1.0, %v428_v28 }
 0xa32   :  { %v430_v1 = vmul.f32 %v792_v27, %v429_v0 }
 0xa34   :  { %v431_v6 = vadd.f32 %v792_v27, %v430_v1 }
 0xa36   :  { %v435_v32 = vsel %vm434_vm10, %v792_v27, %v431_v6 }
 0xa37   :  { %v440_v33 = vsel %vm437_vm11, %v439_v31, %v435_v32 }
 0xa38   :  { %v442_v34 = vmul.f32 2.0, %v440_v33 }
 0xa3a   :  { %v745_v35 = vadd.f32 -1.0, %v442_v34 }
 0xa3c   :  { %v444_v36 = vsel %vm936_vm7, %v745_v35, %v440_v33 }
 0xa3d   :  { %447 = vrot.lane.b32.xlu1 %v444_v36, %s869_s2  ;;  %v445_v39 = vmul.f32 %v444_v36, %v390_v14 }
 0xaaf   :  { %v448_v37 = vpop.permute.xlu1 %447 }
 0xab0   :  { %v450_v38 = vmul.f32 %v448_v37, %v444_v36 }
 0xab2   :  { %452 = vrot.lane.b32.xlu2 %v450_v38, %s870_s22 }
 0xb0c   :  { %v453_v40 = vpop.permute.xlu2 %452 }
 0xb0d   :  { %v455_v41 = vadd.f32 %v453_v40, %v445_v39 }
 0xb0f   :  { %793 = vtanh.f32 %v455_v41 }
 0xb15   :  { %v794_v42 = vpop.eup %793 }
 0xb16   :  { %458 = vrot.lane.b32.xlu0 %v794_v42, %s869_s2 }
 0xb88   :  { %v459_v43 = vpop.permute.xlu0 %458 }
 0xb89   :  { %v461_v44 = vmul.f32 %v459_v43, %v444_v36 }
 0xb8b   :  { %463 = vrot.lane.b32.xlu1 %v461_v44, %s870_s22  ;;  %v131_v44 = vadd.f32 %v969_v46, %v933_v9 }
 0xbfd   :  { %v464_v48 = vpop.permute.xlu1 %463 }
 0xbfe   :  { %746 = vmatmul.msk.f32.vlgmr.msrb.gmra.mxu3 %vm138_vm8, %v464_v48 }
 0xc81   :  { %v484_v51 = vpop.f32.mrf.mxu3 }
 0xc82   :  { %v487_v52 = vadd.f32 %v484_v51, %v125_v50 }
 0xc84   :  { %v747_v53 = vmul.f32 -1.442695, %v487_v52 }
 0xc86   :  { %795 = vpow2.f32 %v747_v53 }
 0xc8c   :  { %v796_v54 = vpop.eup %795 }
 0xc8d   :  { %v491_v55 = vadd.f32 1.0, %v796_v54 }
 0xc8f   :  { %797 = vrcp.f32 %v491_v55  ;;  %v503_v59 = vand.u32 2147483648, %v491_v55  ;;  %v501_v61 = vand.u32 2147483647, %v491_v55  ;;  %vm497_vm0 = vweird.f32 %v491_v55 }
 0xc91   :  { %v504_v63 = vor.u32 1.1754944e-38, %v503_v59  ;;  %vm502_vm14 = vcmp.eq.f32.partialorder %v501_v61, 8.507059e+37 }
 0xc95   :  { %v798_v56 = vpop.eup %797 }
 0xc96   :  { %v493_v57 = vmul.f32 %v798_v56, %v491_v55  ;;  %vm498_vm12 = vweird.f32 %v798_v56 }
 0xc97   :  { %vm499_vm13 = vmor %vm497_vm0, %vm498_vm12 }
 0xc98   :  { %v494_v58 = vsub.f32 1.0, %v493_v57 }
 0xc9a   :  { %v495_v60 = vmul.f32 %v798_v56, %v494_v58 }
 0xc9c   :  { %v496_v62 = vadd.f32 %v798_v56, %v495_v60 }
 0xc9e   :  { %v500_v2 = vsel %vm499_vm13, %v798_v56, %v496_v62 }
 0xc9f   :  { %v505_v3 = vsel %vm502_vm14, %v504_v63, %v500_v2 }
 0xca0   :  { %v507_v5 = vmul.f32 2.0, %v505_v3 }
 0xca2   :  { %v748_v7 = vadd.f32 -1.0, %v507_v5 }
 0xca4   :  { %v509_v10 = vsel %vm936_vm7, %v748_v7, %v505_v3 }
 0xca5   :  { %512 = vrot.lane.b32.xlu2 %v509_v10, %s869_s2  ;;  %v510_v13 = vmul.f32 %v509_v10, %v455_v41 }
 0xcff   :  { %v513_v11 = vpop.permute.xlu2 %512 }
 0xd00   :  { %v515_v12 = vmul.f32 %v513_v11, %v509_v10  ;;  %v40_v11 = vld [vmem:[#allocation2 + $0x48] sm:$0xff] }
 0xd01   :  { %676 = vmatpush.msra.mxu3 %v40_v11 }
 0xd02   :  { %517 = vrot.lane.b32.xlu0 %v515_v12, %s870_s22  ;;  %v39_v12 = vld [vmem:[#allocation2 + $0x40] sm:$0xff] }
 0xd03   :  { %677 = vmatpush.msra.mxu3 %v39_v12 }
 0xd74   :  { %v518_v14 = vpop.permute.xlu0 %517 }
 0xd75   :  { %v520_v15 = vadd.f32 %v518_v14, %v510_v13  ;;  %v38_v13 = vld [vmem:[#allocation2 + $0x38] sm:$0xff] }
 0xd76   :  { %678 = vmatpush.msra.mxu3 %v38_v13 }
 0xd77   :  { %799 = vtanh.f32 %v520_v15 }
 0xd78   :  { %679 = vmatpush.msra.mxu3 %v37_v30 }
 0xd7d   :  { %v800_v16 = vpop.eup %799 }
 0xd7e   :  { %523 = vrot.lane.b32.xlu1 %v800_v16, %s869_s2 }
 0xdf0   :  { %v524_v17 = vpop.permute.xlu1 %523 }
 0xdf1   :  { %v526_v18 = vmul.f32 %v524_v17, %v509_v10  ;;  %v56_v17 = vld [vmem:[#allocation2 + $0xc8] sm:$0xff] }
 0xdf2   :  { %686 = vmatpush.msrb.mxu1 %v56_v17 }
 0xdf3   :  { %528 = vrot.lane.b32.xlu2 %v526_v18, %s870_s22  ;;  %v55_v18 = vld [vmem:[#allocation2 + $0xc0] sm:$0xff] }
 0xdf4   :  { %687 = vmatpush.msrb.mxu1 %v55_v18 }
 0xe4d   :  { %v529_v19 = vpop.permute.xlu2 %528 }
 0xe4e   :  { %749 = vmatmul.msk.f32.vlgmr.msra.gmra.mxu1 %vm138_vm8, %v529_v19  ;;  %v54_v19 = vld [vmem:[#allocation2 + $0xb8] sm:$0xff] }
 0xe4f   :  { %688 = vmatpush.msrb.mxu1 %v54_v19 }
 0xecb   :  { %v549_v21 = vpop.f32.mrf.mxu1 }
 0xecc   :  { %v552_v22 = vadd.f32 %v549_v21, %v128_v20  ;;  %v53_v20 = vld [vmem:[#allocation2 + $0xb0] sm:$0xff]  ;;  %v52_v21 = vld [vmem:[#allocation2 + $0xa8] sm:$0xff] }
 0xecd   :  { %689 = vmatpush.msrb.mxu1 %v53_v20 }
 0xece   :  { %v750_v23 = vmul.f32 -1.442695, %v552_v22  ;;  %v51_v22 = vld [vmem:[#allocation2 + $0xa0] sm:$0xff] }
 0xecf   :  { %690 = vmatpush.msrb.mxu1 %v52_v21 }
 0xed0   :  { %801 = vpow2.f32 %v750_v23  ;;  %v50_v23 = vld [vmem:[#allocation2 + $0x98] sm:$0xff] }
 0xed1   :  { %691 = vmatpush.msrb.mxu1 %v51_v22 }
 0xed3   :  { %692 = vmatpush.msrb.mxu1 %v50_v23 }
 0xed6   :  { %v802_v24 = vpop.eup %801 }
 0xed7   :  { %v556_v25 = vadd.f32 1.0, %v802_v24  ;;  %v49_v24 = vld [vmem:[#allocation2 + $0x90] sm:$0xff] }
 0xed8   :  { %693 = vmatpush.msrb.mxu1 %v49_v24 }
 0xed9   :  { %803 = vrcp.f32 %v556_v25  ;;  %v568_v0 = vand.u32 2147483648, %v556_v25  ;;  %v566_v1 = vand.u32 2147483647, %v556_v25  ;;  %vm562_vm1 = vweird.f32 %v556_v25 }
 0xedb   :  { %v569_v6 = vor.u32 1.1754944e-38, %v568_v0  ;;  %vm567_vm3 = vcmp.eq.f32.partialorder %v566_v1, 8.507059e+37  ;;  %v44_v0 = vld [vmem:[#allocation2 + $0x68] sm:$0xff]  ;;  %v43_v1 = vld [vmem:[#allocation2 + $0x60] sm:$0xff] }
 0xedf   :  { %v804_v26 = vpop.eup %803 }
 0xee0   :  { %v558_v27 = vmul.f32 %v804_v26, %v556_v25  ;;  %vm563_vm15 = vweird.f32 %v804_v26  ;;  %v48_v25 = vld [vmem:[#allocation2 + $0x88] sm:$0xff] }
 0xee1   :  { %vm564_vm2 = vmor %vm562_vm1, %vm563_vm15  ;;  %694 = vmatpush.msrb.mxu1 %v48_v25 }
 0xee2   :  { %v559_v28 = vsub.f32 1.0, %v558_v27  ;;  %v46_v27 = vld [vmem:[#allocation2 + $0x78] sm:$0xff] }
 0xee4   :  { %v560_v29 = vmul.f32 %v804_v26, %v559_v28  ;;  %v45_v28 = vld [vmem:[#allocation2 + $0x70] sm:$0xff] }
 0xee6   :  { %v561_v4 = vadd.f32 %v804_v26, %v560_v29 }
 0xee8   :  { %v565_v31 = vsel %vm564_vm2, %v804_v26, %v561_v4  ;;  %v47_v26 = vld [vmem:[#allocation2 + $0x80] sm:$0xff]  ;;  %v42_v4 = vld [vmem:[#allocation2 + $0x58] sm:$0xff] }
 0xee9   :  { %v570_v45 = vsel %vm567_vm3, %v569_v6, %v565_v31  ;;  %695 = vmatpush.msrb.mxu1 %v47_v26  ;;  %v41_v6 = vld [vmem:[#allocation2 + $0x50] sm:$0xff]  ;;  %v658_v31 = vperm.slane %v930_v8, 1 }
 0xeea   :  { %v572_v32 = vmul.f32 2.0, %v570_v45 }
 0xeeb   :  { %696 = vmatpush.msrb.mxu1 %v46_v27 }
 0xeec   :  { %v751_v33 = vadd.f32 -1.0, %v572_v32 }
 0xeed   :  { %697 = vmatpush.msrb.mxu1 %v45_v28 }
 0xeee   :  { %v574_v34 = vsel %vm936_vm7, %v751_v33, %v570_v45 }
 0xeef   :  { %577 = vrot.lane.b32.xlu0 %v574_v34, %s869_s2  ;;  %v575_v37 = vmul.f32 %v574_v34, %v520_v15  ;;  %698 = vmatpush.msrb.mxu1 %v44_v0 }
 0xef1   :  { %699 = vmatpush.msrb.mxu1 %v43_v1 }
 0xef3   :  { %700 = vmatpush.msrb.mxu1 %v42_v4 }
 0xef5   :  { %701 = vmatpush.msrb.mxu1 %v41_v6 }
 0xf61   :  { %v578_v35 = vpop.permute.xlu0 %577 }
 0xf62   :  { %v580_v36 = vmul.f32 %v578_v35, %v574_v34 }
 0xf64   :  { %582 = vrot.lane.b32.xlu1 %v580_v36, %s870_s22 }
 0xfd6   :  { %v583_v38 = vpop.permute.xlu1 %582 }
 0xfd7   :  { %v585_v39 = vadd.f32 %v583_v38, %v575_v37 }
 0xfd9   :  { %805 = vtanh.f32 %v585_v39 }
 0xfdf   :  { %v806_v40 = vpop.eup %805 }
 0xfe0   :  { %588 = vrot.lane.b32.xlu2 %v806_v40, %s869_s2 }
0x103a   :  { %v589_v41 = vpop.permute.xlu2 %588 }
0x103b   :  { %v591_v42 = vmul.f32 %v589_v41, %v574_v34  ;;  %v685_v34 = vperm.slane %v930_v8, 2 }
0x103d   :  { %593 = vrot.lane.b32.xlu0 %v591_v42, %s870_s22 }
0x10af   :  { %v594_v43 = vpop.permute.xlu0 %593 }
0x10b0   :  { %752 = vmatmul.msk.f32.vlgmr.msrb.gmra.mxu2 %vm138_vm8, %v594_v43 }
0x1133   :  { %v614_v47 = vpop.f32.mrf.mxu2 }
0x1134   :  { %v617_v48 = vadd.f32 %v614_v47, %v131_v44 }
0x1136   :  { %v753_v49 = vmul.f32 -1.442695, %v617_v48 }
0x1138   :  { %807 = vpow2.f32 %v753_v49 }
0x113e   :  { %v808_v50 = vpop.eup %807 }
0x113f   :  { %v621_v51 = vadd.f32 1.0, %v808_v50 }
0x1141   :  { %809 = vrcp.f32 %v621_v51  ;;  %v633_v55 = vand.u32 2147483648, %v621_v51  ;;  %v631_v57 = vand.u32 2147483647, %v621_v51  ;;  %vm627_vm5 = vweird.f32 %v621_v51 }
0x1143   :  { %v634_v59 = vor.u32 1.1754944e-38, %v633_v55  ;;  %vm632_vm9 = vcmp.eq.f32.partialorder %v631_v57, 8.507059e+37 }
0x1147   :  { %v810_v52 = vpop.eup %809 }
0x1148   :  { %v623_v53 = vmul.f32 %v810_v52, %v621_v51  ;;  %vm628_vm4 = vweird.f32 %v810_v52 }
0x1149   :  { %vm629_vm6 = vmor %vm627_vm5, %vm628_vm4 }
0x114a   :  { %v624_v54 = vsub.f32 1.0, %v623_v53 }
0x114c   :  { %v625_v56 = vmul.f32 %v810_v52, %v624_v54 }
0x114e   :  { %v626_v58 = vadd.f32 %v810_v52, %v625_v56 }
0x1150   :  { %v630_v60 = vsel %vm629_vm6, %v810_v52, %v626_v58 }
0x1151   :  { %v635_v9 = vsel %vm632_vm9, %v634_v59, %v630_v60 }
0x1152   :  { %v637_v46 = vmul.f32 2.0, %v635_v9 }
0x1154   :  { %v754_v61 = vadd.f32 -1.0, %v637_v46 }
0x1156   :  { %v639_v62 = vsel %vm936_vm7, %v754_v61, %v635_v9 }
0x1157   :  { %642 = vrot.lane.b32.xlu1 %v639_v62, %s869_s2  ;;  %v640_v3 = vmul.f32 %v639_v62, %v585_v39 }
0x11c9   :  { %v643_v63 = vpop.permute.xlu1 %642 }
0x11ca   :  { %v645_v2 = vmul.f32 %v643_v63, %v639_v62 }
0x11cc   :  { %647 = vrot.lane.b32.xlu2 %v645_v2, %s870_s22 }
0x1226   :  { %v648_v5 = vpop.permute.xlu2 %647 }
0x1227   :  { %v650_v7 = vadd.f32 %v648_v5, %v640_v3 }
0x1229   :  { %811 = vtanh.f32 %v650_v7 }
0x122f   :  { %v812_v10 = vpop.eup %811 }
0x1230   :  { %653 = vrot.lane.b32.xlu0 %v812_v10, %s869_s2 }
0x12a2   :  { %v654_v14 = vpop.permute.xlu0 %653 }
0x12a3   :  { %v656_v15 = vmul.f32 %v654_v14, %v639_v62 }
0x12a5   :  { %v657_v16 = vmax.f32 %v656_v15, 0.0 }
0x12a7   :  { %660 = vrot.lane.b32.xlu1 %v657_v16, %s870_s22 }
0x1319   :  { %v661_v29 = vpop.permute.xlu1 %660 }
0x131a   :  { %755 = vmatmul.msk.f32.vlgmr.msra.gmra.mxu3 %vm138_vm8, %v661_v29 }
0x139d   :  { %v681_v45 = vpop.f32.mrf.mxu3 }
0x139e   :  { %v682_v32 = vadd.f32 %v681_v45, %v658_v31 }
0x13a0   :  { %v684_v33 = vmax.f32 %v682_v32, 0.0 }
0x13a2   :  { %702 = vmatmul.f32.vlgmr.msrb.gmra.mxu1 %v684_v33 }
0x141f   :  { %v703_v35 = vpop.f32.mrf.mxu1 }
0x1420   :  { %v704_v36 = vadd.f32 %v703_v35, %v685_v34 }
0x1422   :  { %706 = vst [vmem:[#allocation5] sm:$0xff] %v704_v36 }
0x1423   :  { %717 = dma.vmem_to_hbm [thread:$0]  %s713_s10, 128, %s715_s13, [#allocation4]  }
0x1424   :  { %863 = dma.done.wait [#allocation4], 128  }
0x1425   :  { %864 = vsyncadd [#allocation4], 4294967168 }
0x1426   :  { %722 = vsyncpa [#allocation3], 1 }
0x1427   :  { %723 = vsyncpa [#allocation4], 1 }

</bundles_post_ra>
